<compile_context>
chip_gen: v7x
topology: tpu7x:2x2x1
jax: 0.10.0
libtpu: 0.0.40
codegen_flags: <defaults>
</compile_context>

<pallas_src>
import jax
import jax.numpy as jnp
from jax.experimental import pallas as pl
from jax.experimental.pallas import tpu as pltpu

LANE = 128  # TPU lane width; hidden feature dim padded to a multiple of this


def decoder_kernel(z_ref, w1_ref, b1_ref, w2_ref, b2_ref, w3_ref, b3_ref, out_ref):
    # z arrives f32 straight from HBM; cast to bf16 in-kernel (no wrapper copy).
    z = z_ref[...].astype(jnp.bfloat16)
    # Layer 1: Linear(latent, hidden_pad) + ReLU (bf16 MXU operands, f32 accumulate)
    h = jnp.dot(z, w1_ref[...], preferred_element_type=jnp.float32) + b1_ref[...]
    h = jnp.maximum(h, 0.0)
    # Layer 2: Linear(hidden_pad, hidden_pad) + ReLU
    h = jnp.dot(h.astype(jnp.bfloat16), w2_ref[...],
                preferred_element_type=jnp.float32) + b2_ref[...]
    h = jnp.maximum(h, 0.0)
    # Layer 3: Linear(hidden_pad, out_channels) + Sigmoid.
    # exp and approx reciprocal both execute in the EUP slot (no VPU divide).
    o = jnp.dot(h.astype(jnp.bfloat16), w3_ref[...],
                preferred_element_type=jnp.float32) + b3_ref[...]
    out_ref[...] = pl.reciprocal(1.0 + jnp.exp(-o), approx=True).astype(out_ref.dtype)


def _pick_tb(batch):
    """Batch-tile selection.

    Small batches: one grid step (grid steps are a serial loop on 1-TC chips,
    each costing ~0.35us of pipeline overhead). Large batches: ~512-row tiles,
    preferring an EVEN step count so v7x megacore sharding stays balanced.
    """
    if batch <= 256:
        return batch
    for tb in (512, 256, 128, 64, 32, 16):          # all 16-aligned (bf16 packing)
        if batch % tb == 0 and (batch // tb) % 2 == 0:
            return tb
    for tb in (512, 256, 128, 64, 32, 16, 8):
        if batch % tb == 0:
            return tb
    return batch


def decoder_forward(z, params, *, tb=None):
    """z: [B, latent_dim] float32. params: dict of transposed (hidden-padded) weights/biases."""
    B, lat = z.shape
    hid_pad = params["w1"].shape[1]
    out_ch = params["w3"].shape[1]
    if tb is None:
        tb = _pick_tb(B)
    assert B % tb == 0, "batch must be divisible by the batch tile"
    assert tb == B or tb % 8 == 0, "batch tile must be 8-aligned or the full batch"

    # Weights/biases: same block every grid step (Pallas skips the re-fetch).
    # TODO(synk): mark these pipeline_mode=pl.Buffered(1) once single-buffering
    # invariant operands is needed for very large hidden sizes on v7x (64 MiB VMEM).
    full = lambda shape: pl.BlockSpec(shape, lambda i: (0, 0))

    grid_spec = pltpu.PrefetchScalarGridSpec(
        num_scalar_prefetch=0,
        grid=(B // tb,),
        in_specs=[
            pl.BlockSpec((tb, lat), lambda i: (i, 0)),    # z tile (f32)
            full((lat, hid_pad)), full((1, hid_pad)),     # layer 1
            full((hid_pad, hid_pad)), full((1, hid_pad)), # layer 2
            full((hid_pad, out_ch)), full((1, out_ch)),   # layer 3 (unpadded out)
        ],
        out_specs=pl.BlockSpec((tb, out_ch), lambda i: (i, 0)),
    )

    # VMEM estimate: double-buffered z/out tiles, weights (x2 buffers), biases,
    # and the f32 hidden intermediates. Only raise the scoped limit when the
    # estimate exceeds the conservative 16 MiB default (v5e's default).
    est = (2 * tb * lat * 4 + 2 * tb * out_ch * 4
           + 2 * (lat * hid_pad + hid_pad * hid_pad + hid_pad * out_ch) * 2
           + 2 * (2 * hid_pad + out_ch) * 4
           + 2 * tb * hid_pad * 4)
    cp_kwargs = dict(dimension_semantics=("parallel",))
    if est > (16 << 20):
        cp_kwargs["vmem_limit_bytes"] = min(2 * est, 64 << 20)

    return pl.pallas_call(
        decoder_kernel,
        out_shape=jax.ShapeDtypeStruct((B, out_ch), jnp.float32),
        grid_spec=grid_spec,
        compiler_params=pltpu.CompilerParams(**cp_kwargs),
    )(z,
      params["w1"], params["b1"],
      params["w2"], params["b2"],
      params["w3"], params["b3"])


def init_params(key, out_channels, hidden_channels, latent_dim):
    """Deterministic init mimicking nn.Linear default U(-1/sqrt(fan_in), 1/sqrt(fan_in)).
    Weights stored [in, out] (transposed vs. PyTorch), bf16 for MXU; biases f32.
    The hidden feature dim is zero-padded to a multiple of 128 lanes (numerically
    free: padded units get zero weight + zero bias -> ReLU(0)=0 -> zero contribution)."""
    hid_pad = ((hidden_channels + LANE - 1) // LANE) * LANE

    def linear(k, fan_in, fan_out, pad_in=None, pad_out=None):
        kw, kb = jax.random.split(k)
        bound = 1.0 / jnp.sqrt(fan_in)
        w = jax.random.uniform(kw, (fan_in, fan_out), jnp.float32, -bound, bound)
        b = jax.random.uniform(kb, (1, fan_out), jnp.float32, -bound, bound)
        pi = (pad_in or fan_in) - fan_in
        po = (pad_out or fan_out) - fan_out
        if pi or po:
            w = jnp.pad(w, ((0, pi), (0, po)))
            b = jnp.pad(b, ((0, 0), (0, po)))
        return w.astype(jnp.bfloat16), b.astype(jnp.float32)

    k1, k2, k3 = jax.random.split(key, 3)
    w1, b1 = linear(k1, latent_dim, hidden_channels, pad_out=hid_pad)
    w2, b2 = linear(k2, hidden_channels, hidden_channels, pad_in=hid_pad, pad_out=hid_pad)
    w3, b3 = linear(k3, hidden_channels, out_channels, pad_in=hid_pad)
    return dict(w1=w1, b1=b1, w2=w2, b2=b2, w3=w3, b3=b3)


def decoder_ref(z, p):
    """Pure-JAX f32 reference (weights upcast from bf16; padded cols contribute 0)."""
    f32 = jnp.float32
    h = jnp.maximum(z.astype(f32) @ p["w1"].astype(f32) + p["b1"], 0.0)
    h = jnp.maximum(h @ p["w2"].astype(f32) + p["b2"], 0.0)
    o = h @ p["w3"].astype(f32) + p["b3"]
    return 1.0 / (1.0 + jnp.exp(-o))


if __name__ == "__main__":
    # Small shapes consistent with the module's Linear-only forward: z is [B, latent_dim].
    batch, out_channels, hidden_channels, latent_dim = 16, 16, 32, 8

    key = jax.random.PRNGKey(0)
    kz, kp = jax.random.split(key)
    z = jax.random.normal(kz, (batch, latent_dim), jnp.float32)
    params = init_params(kp, out_channels, hidden_channels, latent_dim)

    out = decoder_forward(z, params)
    jax.block_until_ready(out)

    out_ref = decoder_ref(z, params)
    # bf16 MXU operands (z cast in-kernel) with f32 accumulation -> loosened tolerance.
    assert out.shape == (batch, out_channels)
    assert jnp.allclose(out, out_ref, atol=2e-2, rtol=2e-2)

    print("KERNEL_OK")
</pallas_src>

<mosaic_0001>
module attributes {stable_mosaic.version = 11 : i64} {
  func.func @decoder_kernel(%arg0: i32, %arg1: memref<16x8xf32, #tpu.memory_space<vmem>>, %arg2: memref<8x128xbf16, #tpu.memory_space<vmem>>, %arg3: memref<1x128xf32, #tpu.memory_space<vmem>>, %arg4: memref<128x128xbf16, #tpu.memory_space<vmem>>, %arg5: memref<1x128xf32, #tpu.memory_space<vmem>>, %arg6: memref<128x16xbf16, #tpu.memory_space<vmem>>, %arg7: memref<1x16xf32, #tpu.memory_space<vmem>>, %arg8: memref<16x16xf32, #tpu.memory_space<vmem>>) attributes {dimension_semantics = [#tpu.dimension_semantics<parallel>], iteration_bounds = array<i64: 1>, scalar_prefetch = 0 : i64, scratch_operands = 0 : i64, tpu.core_type = #tpu.core_type<tc>, window_params = [{transform_indices = @transform_0, window_bounds = array<i64: 16, 8>}, {pipeline_mode = #tpu.pipeline_mode<synchronous>, transform_indices = @transform_1, window_bounds = array<i64: 8, 128>}, {pipeline_mode = #tpu.pipeline_mode<synchronous>, transform_indices = @transform_2, window_bounds = array<i64: 1, 128>}, {pipeline_mode = #tpu.pipeline_mode<synchronous>, transform_indices = @transform_3, window_bounds = array<i64: 128, 128>}, {pipeline_mode = #tpu.pipeline_mode<synchronous>, transform_indices = @transform_4, window_bounds = array<i64: 1, 128>}, {pipeline_mode = #tpu.pipeline_mode<synchronous>, transform_indices = @transform_5, window_bounds = array<i64: 128, 16>}, {pipeline_mode = #tpu.pipeline_mode<synchronous>, transform_indices = @transform_6, window_bounds = array<i64: 1, 16>}, {transform_indices = @transform_7, window_bounds = array<i64: 16, 16>}]} {
    %c0 = arith.constant 0 : index
    %c0_0 = arith.constant 0 : index
    %0 = vector.load %arg1[%c0, %c0_0] : memref<16x8xf32, #tpu.memory_space<vmem>>, vector<16x8xf32>
    %1 = arith.truncf %0 : vector<16x8xf32> to vector<16x8xbf16>
    %c0_1 = arith.constant 0 : index
    %c0_2 = arith.constant 0 : index
    %2 = vector.load %arg2[%c0_1, %c0_2] : memref<8x128xbf16, #tpu.memory_space<vmem>>, vector<8x128xbf16>
    %cst = arith.constant dense<0.000000e+00> : vector<16x128xf32>
    %3 = tpu.matmul %1, %2, %cst {dimension_numbers = #tpu.dot_dimension_numbers<[1], [0], [0], [1], [0, 0, 1, 1], [], []>} : vector<16x8xbf16>, vector<8x128xbf16>, vector<16x128xf32> -> vector<16x128xf32>
    %c0_3 = arith.constant 0 : index
    %c0_4 = arith.constant 0 : index
    %4 = vector.load %arg3[%c0_3, %c0_4] : memref<1x128xf32, #tpu.memory_space<vmem>>, vector<1x128xf32>
    %5 = vector.broadcast %4 : vector<1x128xf32> to vector<16x128xf32>
    %6 = arith.addf %3, %5 : vector<16x128xf32>
    %cst_5 = arith.constant 0.000000e+00 : f32
    %7 = vector.broadcast %cst_5 : f32 to vector<16x128xf32>
    %8 = arith.maximumf %6, %7 : vector<16x128xf32>
    %9 = arith.truncf %8 : vector<16x128xf32> to vector<16x128xbf16>
    %c0_6 = arith.constant 0 : index
    %c0_7 = arith.constant 0 : index
    %10 = vector.load %arg4[%c0_6, %c0_7] : memref<128x128xbf16, #tpu.memory_space<vmem>>, vector<128x128xbf16>
    %cst_8 = arith.constant dense<0.000000e+00> : vector<16x128xf32>
    %11 = tpu.matmul %9, %10, %cst_8 {dimension_numbers = #tpu.dot_dimension_numbers<[1], [0], [0], [1], [0, 0, 1, 1], [], []>} : vector<16x128xbf16>, vector<128x128xbf16>, vector<16x128xf32> -> vector<16x128xf32>
    %c0_9 = arith.constant 0 : index
    %c0_10 = arith.constant 0 : index
    %12 = vector.load %arg5[%c0_9, %c0_10] : memref<1x128xf32, #tpu.memory_space<vmem>>, vector<1x128xf32>
    %13 = vector.broadcast %12 : vector<1x128xf32> to vector<16x128xf32>
    %14 = arith.addf %11, %13 : vector<16x128xf32>
    %cst_11 = arith.constant 0.000000e+00 : f32
    %15 = vector.broadcast %cst_11 : f32 to vector<16x128xf32>
    %16 = arith.maximumf %14, %15 : vector<16x128xf32>
    %17 = arith.truncf %16 : vector<16x128xf32> to vector<16x128xbf16>
    %c0_12 = arith.constant 0 : index
    %c0_13 = arith.constant 0 : index
    %18 = vector.load %arg6[%c0_12, %c0_13] : memref<128x16xbf16, #tpu.memory_space<vmem>>, vector<128x16xbf16>
    %cst_14 = arith.constant dense<0.000000e+00> : vector<16x16xf32>
    %19 = tpu.matmul %17, %18, %cst_14 {dimension_numbers = #tpu.dot_dimension_numbers<[1], [0], [0], [1], [0, 0, 1, 1], [], []>} : vector<16x128xbf16>, vector<128x16xbf16>, vector<16x16xf32> -> vector<16x16xf32>
    %c0_15 = arith.constant 0 : index
    %c0_16 = arith.constant 0 : index
    %20 = vector.load %arg7[%c0_15, %c0_16] : memref<1x16xf32, #tpu.memory_space<vmem>>, vector<1x16xf32>
    %21 = vector.broadcast %20 : vector<1x16xf32> to vector<16x16xf32>
    %22 = arith.addf %19, %21 : vector<16x16xf32>
    %cst_17 = arith.constant 0.000000e+00 : f32
    %23 = vector.broadcast %cst_17 : f32 to vector<16x16xf32>
    %24 = arith.subf %23, %22 : vector<16x16xf32>
    %25 = math.exp %24 : vector<16x16xf32>
    %cst_18 = arith.constant 1.000000e+00 : f32
    %26 = vector.broadcast %cst_18 : f32 to vector<16x16xf32>
    %27 = arith.addf %26, %25 : vector<16x16xf32>
    %28 = tpu.reciprocal %27 {approx = true} : vector<16x16xf32> -> vector<16x16xf32>
    %c0_19 = arith.constant 0 : index
    %c0_20 = arith.constant 0 : index
    %29 = vector.load %arg8[%c0_19, %c0_20] : memref<16x16xf32, #tpu.memory_space<vmem>>, vector<16x16xf32>
    tpu.vector_store %arg8[%c0_19, %c0_20], %28 {strides = array<i32>} : memref<16x16xf32, #tpu.memory_space<vmem>>, vector<16x16xf32>,
    return
  }
  func.func @transform_0(%arg0: i32) -> (i32, i32) {
    %c0_i32 = arith.constant 0 : i32
    %c0_i32_0 = arith.constant 0 : i32
    return %arg0, %c0_i32 : i32, i32
  }
  func.func @transform_1(%arg0: i32) -> (i32, i32) {
    %c0_i32 = arith.constant 0 : i32
    %c0_i32_0 = arith.constant 0 : i32
    %c0_i32_1 = arith.constant 0 : i32
    return %c0_i32, %c0_i32_0 : i32, i32
  }
  func.func @transform_2(%arg0: i32) -> (i32, i32) {
    %c0_i32 = arith.constant 0 : i32
    %c0_i32_0 = arith.constant 0 : i32
    %c0_i32_1 = arith.constant 0 : i32
    return %c0_i32, %c0_i32_0 : i32, i32
  }
  func.func @transform_3(%arg0: i32) -> (i32, i32) {
    %c0_i32 = arith.constant 0 : i32
    %c0_i32_0 = arith.constant 0 : i32
    %c0_i32_1 = arith.constant 0 : i32
    return %c0_i32, %c0_i32_0 : i32, i32
  }
  func.func @transform_4(%arg0: i32) -> (i32, i32) {
    %c0_i32 = arith.constant 0 : i32
    %c0_i32_0 = arith.constant 0 : i32
    %c0_i32_1 = arith.constant 0 : i32
    return %c0_i32, %c0_i32_0 : i32, i32
  }
  func.func @transform_5(%arg0: i32) -> (i32, i32) {
    %c0_i32 = arith.constant 0 : i32
    %c0_i32_0 = arith.constant 0 : i32
    %c0_i32_1 = arith.constant 0 : i32
    return %c0_i32, %c0_i32_0 : i32, i32
  }
  func.func @transform_6(%arg0: i32) -> (i32, i32) {
    %c0_i32 = arith.constant 0 : i32
    %c0_i32_0 = arith.constant 0 : i32
    %c0_i32_1 = arith.constant 0 : i32
    return %c0_i32, %c0_i32_0 : i32, i32
  }
  func.func @transform_7(%arg0: i32) -> (i32, i32) {
    %c0_i32 = arith.constant 0 : i32
    %c0_i32_0 = arith.constant 0 : i32
    return %arg0, %c0_i32 : i32, i32
  }
}

</mosaic_0001>

<bundles_post_ra>
// kernel: tpu_custom_call.1
= control target key start
LH: loop header
LB: loop body
LE: loop exit
PB: predicated region body
PF: predicated region fallthrough
CT: control target
= control target key end

     0   :  { %vm43_vm0 = vcmask 1043456   ;;  %v486_v2 = vmov 0.0   ;;  %vm487_vm1 = vmmov 0   ;;  %vm39_vm2 = vcmask 64512   ;;  %s629_s0 = inlined_call_operand.vmem [shape: f32[16,8], index: 0, kind: input, shape index: {}]   ;;  %s630_s1 = inlined_call_operand.vmem [shape: bf16[8,128], index: 1, kind: input, shape index: {}]   ;;  %s631_s2 = inlined_call_operand.vmem [shape: f32[1,128], index: 2, kind: input, shape index: {}]   ;;  %s632_s3 = inlined_call_operand.vmem [shape: bf16[128,128], index: 3, kind: input, shape index: {}]   ;;  %s633_s4 = inlined_call_operand.vmem [shape: f32[1,128], index: 4, kind: input, shape index: {}]   ;;  %s634_s5 = inlined_call_operand.vmem [shape: bf16[128,16], index: 5, kind: input, shape index: {}]   ;;  %s635_s6 = inlined_call_operand.vmem [shape: f32[1,16], index: 6, kind: input, shape index: {}]   ;;  %s636_s7 = inlined_call_operand.hbm [shape: f32[16,16], index: 7, kind: output, shape index: {}]  }
   0x1   :  { %v31_v0 = vld [vmem:[%s630_s1] sm:$0xf]  ;;  %387 = vmatprep.subr.bf16.mxu0 %v486_v2  ;;  %389 = vmatprep.mubr.msk.bf16.mxu0 %vm487_vm1, %v486_v2  ;;  %v29_v4 = vld [vmem:[%s629_s0 + $0x8] sm:$0xff]  ;;  %v440_v8 = vld [vmem:[%s632_s3 + $0x10] sm:$0xff]  }
   0x2   :  { %v28_v1 = vld [vmem:[%s629_s0] sm:$0xff]  ;;  %v45_v3 = vsel %vm43_vm0, %v31_v0, 0  ;;  %393 = vmatprep.subr.bf16.mxu1 %v486_v2  ;;  %v439_v7 = vld [vmem:[%s632_s3 + $0x8] sm:$0xff]   ;;  %409 = vmatprep.mubr.msk.bf16.mxu1 %vm487_vm1, %v486_v2  ;;  %v441_v9 = vld [vmem:[%s632_s3 + $0x18] sm:$0xff]  }
   0x3   :  { %v438_v5 = vld [vmem:[%s632_s3] sm:$0xff]   ;;  %388 = vmatpush3.bf16.msra.mxu0 %v45_v3  ;;  %v30_v6 = vpack.c.bf16 %v29_v4, %v28_v1 }
   0x4   :  { %394 = vmatpush3.bf16.msra.mxu1 %v438_v5  ;;  %413 = vmatprep.subr.bf16.mxu0 %v486_v2 }
   0x5   :  { %395 = vmatprep.subr.bf16.mxu1 %v486_v2 }
   0x6   :  { %390 = vmatmul.mubr.msk.bf16.vlgmr.msra.gmra.mrb[0].mxu0 %vm39_vm2, %v30_v6 }
   0x7   :  { %429 = vmatprep.mubr.msk.bf16.mxu0 %vm487_vm1, %v486_v2 }
   0x8   :  { %396 = vmatpush3.bf16.msra.mxu1 %v439_v7 }
   0x9   :  { %397 = vmatprep.subr.bf16.mxu1 %v486_v2 }
   0xc   :  { %398 = vmatpush3.bf16.msra.mxu1 %v440_v8 }
   0xd   :  { %399 = vmatprep.subr.bf16.mxu1 %v486_v2 }
   0xe   :  { %12 = vsyncpa [#allocation3], 0  ;;  %v442_v10 = vld [vmem:[%s632_s3 + $0x20] sm:$0xff]   ;;  %v443_v11 = vld [vmem:[%s632_s3 + $0x28] sm:$0xff]   ;;  %vm328_vm3 = vcmask 130048  }
   0xf   :  { %v444_v12 = vld [vmem:[%s632_s3 + $0x30] sm:$0xff]   ;;  %v445_v13 = vld [vmem:[%s632_s3 + $0x38] sm:$0xff]   ;;  %v446_v14 = vld [vmem:[%s634_s5] sm:$0xff]  }
  0x10   :  { %400 = vmatpush3.bf16.msra.mxu1 %v441_v9  ;;  %414 = vmatpush3.bf16.msra.mxu0 %v446_v14  ;;  %v447_v15 = vld [vmem:[%s634_s5 + $0x8] sm:$0xff]   ;;  %v448_v16 = vld [vmem:[%s634_s5 + $0x10] sm:$0xff]   ;;  %v449_v17 = vld [vmem:[%s634_s5 + $0x18] sm:$0xff]  }
  0x11   :  { %401 = vmatprep.subr.bf16.mxu1 %v486_v2  ;;  %415 = vmatprep.subr.bf16.mxu0 %v486_v2  ;;  %v450_v18 = vld [vmem:[%s634_s5 + $0x20] sm:$0xff]   ;;  %v451_v19 = vld [vmem:[%s634_s5 + $0x28] sm:$0xff]   ;;  %v452_v30 = vld [vmem:[%s634_s5 + $0x30] sm:$0xff]  }
  0x12   :  { %v347_v20 = vld [vmem:[%s631_s2] ss:$0 sm:$0xff]  ;;  %v453_v31 = vld [vmem:[%s634_s5 + $0x38] sm:$0xff]  }
  0x13   :  { %v349_v32 = vld [vmem:[%s633_s4] ss:$0 sm:$0xff]  ;;  %s488_s4 = smov [#allocation2]  }
  0x14   :  { %402 = vmatpush3.bf16.msra.mxu1 %v442_v10  ;;  %416 = vmatpush3.bf16.msra.mxu0 %v447_v15  ;;  %v358_v42 = vld [vmem:[%s635_s6] ss:$0 sm:$0xff]  ;;  %s336_s5 = sshll.u32 %s488_s4, 4  ;;  %s337_s5 = int_to_ptr.vmem [resolvable:$true] %s336_s5 }
  0x15   :  { %403 = vmatprep.subr.bf16.mxu1 %v486_v2  ;;  %417 = vmatprep.subr.bf16.mxu0 %v486_v2  ;;  %s462_s6 = scalar_lea.vmem %s337_s5, 256  ;;  %p467_p1 = scmp.lt.s32.totalorder %s337_s5, %s337_s5 }
  0x16   :  { %p463_p0 = scmp.ne.s32.totalorder %s337_s5, %s462_s6  ;;  %p468_p2 = scmp.lt.s32.totalorder %s462_s6, %s462_s6 }
  0x18   :  { %404 = vmatpush3.bf16.msra.mxu1 %v443_v11  ;;  %418 = vmatpush3.bf16.msra.mxu0 %v448_v16  ;;  %p469_p3 = por %p468_p2, %p467_p1 }
  0x19   :  { %405 = vmatprep.subr.bf16.mxu1 %v486_v2  ;;  %419 = vmatprep.subr.bf16.mxu0 %v486_v2 }
  0x1a   :  { %p470_p4 = pnand %p469_p3, %p463_p0 }
  0x1c   :  { %406 = vmatpush3.bf16.msra.mxu1 %v444_v12  ;;  %420 = vmatpush3.bf16.msra.mxu0 %v449_v17 }
  0x1d   :  { %407 = vmatprep.subr.bf16.mxu1 %v486_v2  ;;  %421 = vmatprep.subr.bf16.mxu0 %v486_v2 }
  0x20   :  { %408 = vmatpush3.bf16.msra.mxu1 %v445_v13  ;;  %422 = vmatpush3.bf16.msra.mxu0 %v450_v18 }
  0x21   :  { %423 = vmatprep.subr.bf16.mxu0 %v486_v2 }
  0x24   :  { %424 = vmatpush3.bf16.msra.mxu0 %v451_v19 }
  0x25   :  { %425 = vmatprep.subr.bf16.mxu0 %v486_v2 }
  0x28   :  { %426 = vmatpush3.bf16.msra.mxu0 %v452_v30 }
  0x29   :  { %427 = vmatprep.subr.bf16.mxu0 %v486_v2 }
  0x2c   :  { %428 = vmatpush3.bf16.msra.mxu0 %v453_v31 }
  0xd9   :  { %v81_v21 = vpop.f32.mrb[0].mxu0 }
  0xda   :  { %v82_v22 = vadd.f32 %v347_v20, %v81_v21  ;;  %v391_v23 = vpop.f32.mrb[1].mxu0 }
  0xdb   :  { %v84_v24 = vpop.f32.mrb[2].mxu0 }
  0xdc   :  { %v85_v25 = vadd.f32 %v347_v20, %v84_v24  ;;  %v392_v26 = vpop.f32.mrb[3].mxu0  ;;  %v88_v27 = vmax.f32 %v82_v22, 0.0 }
  0xde   :  { %v89_v28 = vmax.f32 %v85_v25, 0.0 }
  0xe0   :  { %v90_v29 = vpack.c.bf16 %v89_v28, %v88_v27 }
  0xe2   :  { %410 = vmatmul.mubr.bf16.vlgmr.msra.gmra.mrb[0].mxu1 %v90_v29 }
 0x1b5   :  { %v196_v33 = vpop.f32.mrb[0].mxu1 }
 0x1b6   :  { %v197_v34 = vadd.f32 %v349_v32, %v196_v33  ;;  %v411_v35 = vpop.f32.mrb[1].mxu1 }
 0x1b7   :  { %v199_v36 = vpop.f32.mrb[2].mxu1 }
 0x1b8   :  { %v200_v37 = vadd.f32 %v349_v32, %v199_v36  ;;  %v412_v38 = vpop.f32.mrb[3].mxu1  ;;  %v203_v39 = vmax.f32 %v197_v34, 0.0 }
 0x1ba   :  { %v204_v40 = vmax.f32 %v200_v37, 0.0 }
 0x1bc   :  { %v205_v41 = vpack.c.bf16 %v204_v40, %v203_v39 }
 0x1be   :  { %430 = vmatmul.mubr.bf16.vlgmr.msra.gmra.mrb[4].mxu0 %v205_v41 }
 0x291   :  { %v311_v43 = vpop.f32.mrb[4].mxu0 }
 0x292   :  { %v312_v44 = vadd.f32 %v358_v42, %v311_v43  ;;  %v431_v45 = vpop.f32.mrb[5].mxu0 }
 0x293   :  { %v314_v46 = vpop.f32.mrb[6].mxu0 }
 0x294   :  { %v318_v47 = vsub.f32 0.0, %v312_v44  ;;  %v315_v48 = vadd.f32 %v358_v42, %v314_v46  ;;  %v432_v49 = vpop.f32.mrb[7].mxu0 }
 0x296   :  { %v320_v50 = vmul.f32 1.442695, %v318_v47  ;;  %v319_v51 = vsub.f32 0.0, %v315_v48 }
 0x298   :  { %454 = vpow2.f32 %v320_v50  ;;  %v322_v52 = vmul.f32 1.442695, %v319_v51 }
 0x29a   :  { %456 = vpow2.f32 %v322_v52 }
 0x2a2   :  { %v455_v53 = vpop.eup %454 }
 0x2a3   :  { %v324_v54 = vadd.f32 1.0, %v455_v53 }
 0x2a4   :  { %v457_v55 = vpop.eup %456 }
 0x2a5   :  { %458 = vrcp.f32 %v324_v54  ;;  %v325_v56 = vadd.f32 1.0, %v457_v55 }
 0x2a7   :  { %460 = vrcp.f32 %v325_v56 }
 0x2af   :  { %v459_v57 = vpop.eup %458 }
 0x2b0   :  { %329 = vst.msk [vmem:[#allocation2] sm:$0xff] %vm328_vm3, %v459_v57 }
 0x2b1   :  { %v461_v58 = vpop.eup %460 }
 0x2b2   :  { %330 = vst.msk [vmem:[#allocation2 + $0x8] sm:$0xff] %vm328_vm3, %v461_v58 }
 0x2b3   :  { %473 = shalt.err (!%p470_p4)
}
 0x2b4   :  { %s474_s18 = scalar_lea.hbm %s636_s7, 256 }
 0x2b5   :  { %p475_p5 = scmp.ne.s32.totalorder %s636_s7, %s474_s18  ;;  %p478_p6 = scmp.lt.u32.totalorder %s474_s18, %s636_s7 }
 0x2b7   :  { %p480_p7 = pnand %p478_p6, %p475_p5 }
 0x2b9   :  { %483 = shalt.err (!%p480_p7)
}
 0x2ba   :  { %s489_s23 = smov 128   ;;  %s490_s24 = smov 8  }
 0x2bb   :  { %342 = dma.vmem_to_hbm [thread:$0]  %s337_s5, 256, %s636_s7, [#allocation3], %s489_s23, %s489_s23, %s490_s24  }
 0x2bc   :  { %484 = dma.done.wait [#allocation3], 256  }
 0x2bd   :  { %485 = vsyncadd [#allocation3], 4294967040 }
 0x2be   :  { %346 = vsyncpa [#allocation3], 1 }

</bundles_post_ra>
